<compile_context>
chip_gen: v7x
topology: tpu7x:2x2x1
jax: 0.10.0
libtpu: 0.0.40
codegen_flags: <defaults>
</compile_context>

<pallas_src>
import functools

import jax
import jax.numpy as jnp
from jax.experimental import pallas as pl
from jax.experimental.pallas import tpu as pltpu


def _conv1x1_kernel(x_ref, w_ref, b_ref, o_ref, *, precision):
    # x_ref: (Nb, C_in, T)   -- spatial columns on the 128-lane axis
    # w_ref: (C_out, C_in)   -- resident across the whole grid
    # b_ref: (C_out, 1)      -- resident
    # o_ref: (Nb, C_out, T)  -- lane-dense stores
    w = w_ref[...]
    b = b_ref[...].astype(jnp.float32)
    nb = x_ref.shape[0]
    for i in range(nb):  # static unroll; Nb is capped at 8
        acc = jnp.dot(w, x_ref[i], preferred_element_type=jnp.float32,
                      precision=precision)
        o_ref[i] = (acc + b).astype(o_ref.dtype)


def _tpu_memory_config():
    """Returns (physical VMEM bytes per core, #TensorCores sharing the grid)."""
    phys = None
    try:
        phys = int(pltpu.get_tpu_info().vmem_capacity_bytes)
    except Exception:
        phys = None
    kind = ""
    try:
        kind = jax.devices()[0].device_kind.lower()
    except Exception:
        pass
    if phys is None:
        phys = 64 * 1024 * 1024 if "v7" in kind else 128 * 1024 * 1024
    cores = 2 if "v7" in kind else 1  # v7x: 2 TCs split "parallel" grid axes
    return phys, cores


def _spatial_tile_candidates(hw):
    """Descending list of legal lane-dense spatial tiles for extent `hw`."""
    if hw % 128 == 0:
        return [t for t in range(hw, 0, -128) if hw % t == 0]
    return [hw]  # the full extent is always a legal block shape


def _choose_tiles(n, hw, per_col_bytes, budget_bytes, min_grid_points):
    """Pick (Nb, t): batch rows per block and spatial tile.

    Largest lane-dense spatial tile that fits the VMEM budget (prefer t == hw:
    one contiguous DMA per block), shrunk only as far as needed so every
    TensorCore gets at least one grid point; then fold batch rows into the
    block to raise per-step DMA granularity without dropping below that count.
    """
    cands = _spatial_tile_candidates(hw)
    t = cands[-1]
    for c in cands:                         # descending: prefer the largest
        if per_col_bytes * c <= budget_bytes:
            t = c
            break
    if n * (hw // t) < min_grid_points:     # v7x: don't idle a TensorCore
        for c in cands:
            if c <= t and n * (hw // c) >= min_grid_points:
                t = c
                break
    nb = 1
    for cand in range(min(n, 8), 0, -1):    # cap kernel unroll at 8 rows/step
        if n % cand:
            continue
        if cand > 1 and cand * per_col_bytes * t > budget_bytes:
            continue
        if cand > 1 and (n // cand) * (hw // t) < min_grid_points:
            continue
        nb = cand
        break
    return nb, t


def conv1x1(x_nchw, weight, bias, *, hw_tile=None, batch_tile=None,
            precision=jax.lax.Precision.HIGHEST):
    """1x1 stride-1 conv, equivalent to nn.Conv2d(c_in, c_out, kernel_size=1).

    x_nchw: (N, C_in, H, W), weight: (C_out, C_in, 1, 1), bias: (C_out,)
    returns (N, C_out, H, W)
    """
    N, C_in, H, W = x_nchw.shape
    C_out = weight.shape[0]
    HW = H * W
    itemsize = jnp.dtype(x_nchw.dtype).itemsize

    phys_vmem, n_cores = _tpu_memory_config()
    vmem_limit = (phys_vmem * 3) // 4        # 48 MiB on v7x, 96 MiB on v5e/v6e
    budget = int(vmem_limit * 0.9)           # tile budget = limit - headroom

    # Free reshapes only -- no HBM transpose passes; spatial axis on lanes.
    x3 = x_nchw.reshape(N, C_in, HW)
    w2 = weight.reshape(C_out, C_in)
    b2 = bias.reshape(C_out, 1)

    # Bytes per spatial column per batch row: double-buffered input + output.
    per_col = 2 * (C_in + C_out) * itemsize

    # Non-128-divisible spatial extent: keep the full extent if it fits the
    # budget, otherwise zero-pad to a 128 multiple so it can be tiled.
    HW_pad = HW
    if HW % 128 != 0 and per_col * HW > budget:
        HW_pad = ((HW + 127) // 128) * 128
        x3 = jnp.pad(x3, ((0, 0), (0, 0), (0, HW_pad - HW)))

    Nb, t = _choose_tiles(N, HW_pad, per_col, budget, min_grid_points=n_cores)
    if hw_tile is not None:
        t = hw_tile
    if batch_tile is not None:
        Nb = batch_tile
    assert HW_pad % t == 0 and N % Nb == 0

    # TODO(synk): for very large C_in, add a third "arbitrary" grid axis over
    # C_in chunks with an f32 VMEM accumulator (init at k==0, write at last k)
    # so (C_in + C_out) * t stops bounding the tile on v7x's 64 MiB VMEM.
    # TODO(synk): if per-step input DMA stays tiny (very small C_in), sweep
    # pipeline_mode=pl.Buffered(3) on the x BlockSpec; keep only if measured.

    kernel = functools.partial(_conv1x1_kernel, precision=precision)

    out3 = pl.pallas_call(
        kernel,
        out_shape=jax.ShapeDtypeStruct((N, C_out, HW_pad), x_nchw.dtype),
        grid_spec=pltpu.PrefetchScalarGridSpec(
            num_scalar_prefetch=0,
            grid=(N // Nb, HW_pad // t),
            in_specs=[
                pl.BlockSpec((Nb, C_in, t), lambda n, j: (n, 0, j)),   # x tile
                pl.BlockSpec((C_out, C_in), lambda n, j: (0, 0)),      # weight (resident)
                pl.BlockSpec((C_out, 1), lambda n, j: (0, 0)),         # bias (resident)
            ],
            out_specs=pl.BlockSpec((Nb, C_out, t), lambda n, j: (n, 0, j)),
        ),
        compiler_params=pltpu.CompilerParams(
            dimension_semantics=("parallel", "parallel"),
            vmem_limit_bytes=vmem_limit,
        ),
    )(x3, w2, b2)

    if HW_pad != HW:
        out3 = out3[:, :, :HW]
    return out3.reshape(N, C_out, H, W)


def init_conv_params(key, c_in, c_out, dtype=jnp.float32):
    """Deterministic init matching nn.Conv2d + xavier_uniform_ on the weight."""
    kw, kb = jax.random.split(key)
    bound_w = (6.0 / (c_in + c_out)) ** 0.5            # Xavier uniform
    weight = jax.random.uniform(kw, (c_out, c_in, 1, 1), dtype,
                                minval=-bound_w, maxval=bound_w)
    bound_b = 1.0 / (c_in ** 0.5)                      # PyTorch default bias init
    bias = jax.random.uniform(kb, (c_out,), dtype,
                              minval=-bound_b, maxval=bound_b)
    return weight, bias


if __name__ == "__main__":
    key = jax.random.PRNGKey(0)
    k_x, k_p, k_x2, k_p2 = jax.random.split(key, 4)

    # Small-channel case matching the module's spec (batch folded into block).
    N, C_in, H, W, C_out = 2, 4, 16, 16, 8
    x = jax.random.normal(k_x, (N, C_in, H, W), jnp.float32)
    weight, bias = init_conv_params(k_p, C_in, C_out)
    out = jax.block_until_ready(conv1x1(x, weight, bias))
    ref = (jnp.einsum("nchw,oc->nohw", x, weight.reshape(C_out, C_in),
                      precision=jax.lax.Precision.HIGHEST)
           + bias.reshape(1, C_out, 1, 1))
    assert out.shape == (N, C_out, H, W)
    # Conservative tolerance; precision=HIGHEST gives ~1e-6-level agreement.
    assert jnp.allclose(out, ref, atol=1e-2, rtol=1e-2)

    # Wider-channel case.
    C_in2, C_out2 = 32, 32
    x2 = jax.random.normal(k_x2, (N, C_in2, H, W), jnp.float32)
    w2, b2 = init_conv_params(k_p2, C_in2, C_out2)
    out2 = jax.block_until_ready(conv1x1(x2, w2, b2))
    ref2 = (jnp.einsum("nchw,oc->nohw", x2, w2.reshape(C_out2, C_in2),
                       precision=jax.lax.Precision.HIGHEST)
            + b2.reshape(1, C_out2, 1, 1))
    assert jnp.allclose(out2, ref2, atol=1e-2, rtol=1e-2)

    print("KERNEL_OK")
</pallas_src>

<mosaic_0001>
module attributes {stable_mosaic.version = 11 : i64} {
  func.func @_conv1x1_kernel(%arg0: i32, %arg1: i32, %arg2: memref<2x4x256xf32, #tpu.memory_space<vmem>>, %arg3: memref<8x4xf32, #tpu.memory_space<vmem>>, %arg4: memref<8x1xf32, #tpu.memory_space<vmem>>, %arg5: memref<2x8x256xf32, #tpu.memory_space<vmem>>) attributes {dimension_semantics = [#tpu.dimension_semantics<parallel>, #tpu.dimension_semantics<parallel>], iteration_bounds = array<i64: 1, 1>, scalar_prefetch = 0 : i64, scratch_operands = 0 : i64, tpu.core_type = #tpu.core_type<tc>, window_params = [{transform_indices = @transform_0, window_bounds = array<i64: 2, 4, 256>}, {pipeline_mode = #tpu.pipeline_mode<synchronous>, transform_indices = @transform_1, window_bounds = array<i64: 8, 4>}, {pipeline_mode = #tpu.pipeline_mode<synchronous>, transform_indices = @transform_2, window_bounds = array<i64: 8, 1>}, {transform_indices = @transform_3, window_bounds = array<i64: 2, 8, 256>}]} {
    %c0 = arith.constant 0 : index
    %c0_0 = arith.constant 0 : index
    %0 = vector.load %arg3[%c0, %c0_0] : memref<8x4xf32, #tpu.memory_space<vmem>>, vector<8x4xf32>
    %c0_1 = arith.constant 0 : index
    %c0_2 = arith.constant 0 : index
    %1 = vector.load %arg4[%c0_1, %c0_2] : memref<8x1xf32, #tpu.memory_space<vmem>>, vector<8x1xf32>
    %c0_3 = arith.constant 0 : index
    %c0_4 = arith.constant 0 : index
    %c0_5 = arith.constant 0 : index
    %2 = vector.load %arg2[%c0_3, %c0_4, %c0_5] : memref<2x4x256xf32, #tpu.memory_space<vmem>>, vector<1x4x256xf32>
    %3 = vector.shape_cast %2 : vector<1x4x256xf32> to vector<4x256xf32>
    %cst = arith.constant dense<0.000000e+00> : vector<8x256xf32>
    %4 = tpu.matmul %0, %3, %cst {dimension_numbers = #tpu.dot_dimension_numbers<[1], [0], [0], [1], [0, 0, 1, 1], [], []>, precision = #tpu.contract_precision<fp32>} : vector<8x4xf32>, vector<4x256xf32>, vector<8x256xf32> -> vector<8x256xf32>
    %5 = vector.broadcast %1 : vector<8x1xf32> to vector<8x256xf32>
    %6 = arith.addf %4, %5 : vector<8x256xf32>
    %c0_6 = arith.constant 0 : index
    %c0_7 = arith.constant 0 : index
    %c0_8 = arith.constant 0 : index
    %7 = vector.load %arg5[%c0_6, %c0_7, %c0_8] : memref<2x8x256xf32, #tpu.memory_space<vmem>>, vector<1x8x256xf32>
    %8 = vector.shape_cast %7 : vector<1x8x256xf32> to vector<8x256xf32>
    %9 = vector.shape_cast %6 : vector<8x256xf32> to vector<1x8x256xf32>
    tpu.vector_store %arg5[%c0_6, %c0_7, %c0_8], %9 {strides = array<i32>} : memref<2x8x256xf32, #tpu.memory_space<vmem>>, vector<1x8x256xf32>,
    %c1 = arith.constant 1 : index
    %c0_9 = arith.constant 0 : index
    %c0_10 = arith.constant 0 : index
    %10 = vector.load %arg2[%c1, %c0_9, %c0_10] : memref<2x4x256xf32, #tpu.memory_space<vmem>>, vector<1x4x256xf32>
    %11 = vector.shape_cast %10 : vector<1x4x256xf32> to vector<4x256xf32>
    %cst_11 = arith.constant dense<0.000000e+00> : vector<8x256xf32>
    %12 = tpu.matmul %0, %11, %cst_11 {dimension_numbers = #tpu.dot_dimension_numbers<[1], [0], [0], [1], [0, 0, 1, 1], [], []>, precision = #tpu.contract_precision<fp32>} : vector<8x4xf32>, vector<4x256xf32>, vector<8x256xf32> -> vector<8x256xf32>
    %13 = vector.broadcast %1 : vector<8x1xf32> to vector<8x256xf32>
    %14 = arith.addf %12, %13 : vector<8x256xf32>
    %c1_12 = arith.constant 1 : index
    %c0_13 = arith.constant 0 : index
    %c0_14 = arith.constant 0 : index
    %15 = vector.load %arg5[%c1_12, %c0_13, %c0_14] : memref<2x8x256xf32, #tpu.memory_space<vmem>>, vector<1x8x256xf32>
    %16 = vector.shape_cast %15 : vector<1x8x256xf32> to vector<8x256xf32>
    %17 = vector.shape_cast %14 : vector<8x256xf32> to vector<1x8x256xf32>
    tpu.vector_store %arg5[%c1_12, %c0_13, %c0_14], %17 {strides = array<i32>} : memref<2x8x256xf32, #tpu.memory_space<vmem>>, vector<1x8x256xf32>,
    return
  }
  func.func @transform_0(%arg0: i32, %arg1: i32) -> (i32, i32, i32) {
    %c0_i32 = arith.constant 0 : i32
    %c0_i32_0 = arith.constant 0 : i32
    return %arg0, %c0_i32, %arg1 : i32, i32, i32
  }
  func.func @transform_1(%arg0: i32, %arg1: i32) -> (i32, i32) {
    %c0_i32 = arith.constant 0 : i32
    %c0_i32_0 = arith.constant 0 : i32
    %c0_i32_1 = arith.constant 0 : i32
    return %c0_i32, %c0_i32_0 : i32, i32
  }
  func.func @transform_2(%arg0: i32, %arg1: i32) -> (i32, i32) {
    %c0_i32 = arith.constant 0 : i32
    %c0_i32_0 = arith.constant 0 : i32
    %c0_i32_1 = arith.constant 0 : i32
    return %c0_i32, %c0_i32_0 : i32, i32
  }
  func.func @transform_3(%arg0: i32, %arg1: i32) -> (i32, i32, i32) {
    %c0_i32 = arith.constant 0 : i32
    %c0_i32_0 = arith.constant 0 : i32
    return %arg0, %c0_i32, %arg1 : i32, i32, i32
  }
}

</mosaic_0001>

<bundles_post_ra>
// kernel: tpu_custom_call.1
= control target key start
LH: loop header
LB: loop body
LE: loop exit
PB: predicated region body
PF: predicated region fallthrough
CT: control target
= control target key end

     0   :  { %8 = vsyncpa [#allocation3], 0  ;;  %s1281_s0 = inlined_call_operand.hbm [shape: f32[2,4,256], index: 0, kind: input, shape index: {}]   ;;  %s1282_s1 = inlined_call_operand.hbm [shape: f32[8,4], index: 1, kind: input, shape index: {}]   ;;  %s1283_s2 = inlined_call_operand.hbm [shape: f32[8,1], index: 2, kind: input, shape index: {}]   ;;  %s1284_s3 = inlined_call_operand.hbm [shape: f32[2,8,256], index: 3, kind: output, shape index: {}]  }
   0x1   :  { %9 = vsyncpa [#allocation6], 0 }
   0x2   :  { %10 = vsyncpa [#allocation4], 0  ;;  %s1163_s12 = smov [#allocation5]   ;;  %s1164_s14 = smov [#allocation2]  }
   0x3   :  { %s29_s13 = sshll.u32 %s1163_s12, 4  ;;  %s16_s15 = sshll.u32 %s1164_s14, 4  ;;  %s30_s13 = int_to_ptr.vmem [resolvable:$true] %s29_s13  ;;  %s1193_s15 = int_to_ptr.vmem [resolvable:$true] %s16_s15 }
   0x4   :  { %s1069_s18 = scalar_lea.hbm %s1282_s1, 128 }
   0x5   :  { %p1070_p0 = scmp.ne.s32.totalorder %s1282_s1, %s1069_s18  ;;  %p1073_p1 = scmp.lt.u32.totalorder %s1069_s18, %s1282_s1 }
   0x7   :  { %p1075_p2 = pnand %p1073_p1, %p1070_p0 }
   0x9   :  { %1078 = shalt.err (!%p1075_p2)
}
   0xa   :  { %s1079_s23 = scalar_lea.vmem %s30_s13, 128  ;;  %p1084_p4 = scmp.lt.s32.totalorder %s30_s13, %s30_s13 }
   0xb   :  { %p1080_p3 = scmp.ne.s32.totalorder %s30_s13, %s1079_s23  ;;  %p1085_p5 = scmp.lt.s32.totalorder %s1079_s23, %s1079_s23 }
   0xd   :  { %p1086_p6 = por %p1085_p5, %p1084_p4 }
   0xf   :  { %p1087_p7 = pnand %p1086_p6, %p1080_p3 }
  0x11   :  { %1090 = shalt.err (!%p1087_p7)
}
  0x12   :  { %32 = dma.hbm_to_vmem [thread:$0]  %s1282_s1, 128, %s30_s13, [#allocation6]  }
  0x13   :  { %s1091_s28 = scalar_lea.hbm %s1281_s0, 256 }
  0x14   :  { %p1092_p8 = scmp.ne.s32.totalorder %s1281_s0, %s1091_s28  ;;  %p1095_p9 = scmp.lt.u32.totalorder %s1091_s28, %s1281_s0 }
  0x16   :  { %p1097_p10 = pnand %p1095_p9, %p1092_p8 }
  0x18   :  { %1100 = shalt.err (!%p1097_p10)
}
  0x19   :  { %s1101_s6 = scalar_lea.vmem %s1193_s15, 256  ;;  %p1106_p12 = scmp.lt.s32.totalorder %s1193_s15, %s1193_s15 }
  0x1a   :  { %p1102_p11 = scmp.ne.s32.totalorder %s1193_s15, %s1101_s6  ;;  %p1107_p13 = scmp.lt.s32.totalorder %s1101_s6, %s1101_s6 }
  0x1c   :  { %p1108_p0 = por %p1107_p13, %p1106_p12 }
  0x1e   :  { %p1109_p1 = pnand %p1108_p0, %p1102_p11 }
  0x20   :  { %1112 = shalt.err (!%p1109_p1)
}
  0x21   :  { %s1165_s1 = smov 128   ;;  %s1166_s7 = smov 8  }
  0x22   :  { %22 = dma.hbm_to_vmem [thread:$0]  %s1281_s0, 256, %s1193_s15, [#allocation3], %s1165_s1, %s1165_s1, %s1166_s7  }
  0x23   :  { %s1167_s10 = smov [#allocation7]   ;;  %s1113_s14 = scalar_lea.hbm %s1283_s2, 128 }
  0x24   :  { %s39_s11 = sshll.u32 %s1167_s10, 4  ;;  %p1114_p2 = scmp.ne.s32.totalorder %s1283_s2, %s1113_s14  ;;  %s40_s11 = int_to_ptr.vmem [resolvable:$true] %s39_s11 }
  0x25   :  { %p1117_p3 = scmp.lt.u32.totalorder %s1113_s14, %s1283_s2 }
  0x27   :  { %p1119_p4 = pnand %p1117_p3, %p1114_p2 }
  0x29   :  { %1122 = shalt.err (!%p1119_p4)
}
  0x2a   :  { %s1123_s20 = scalar_lea.vmem %s40_s11, 128  ;;  %p1128_p6 = scmp.lt.s32.totalorder %s40_s11, %s40_s11 }
  0x2b   :  { %p1124_p5 = scmp.ne.s32.totalorder %s40_s11, %s1123_s20  ;;  %p1129_p7 = scmp.lt.s32.totalorder %s1123_s20, %s1123_s20 }
  0x2d   :  { %p1130_p8 = por %p1129_p7, %p1128_p6 }
  0x2f   :  { %p1131_p9 = pnand %p1130_p8, %p1124_p5 }
  0x31   :  { %1134 = shalt.err (!%p1131_p9)
}
  0x32   :  { %42 = dma.hbm_to_vmem [thread:$0]  %s1283_s2, 128, %s40_s11, [#allocation6]  }
  0x33   :  { %1157 = dma.done.wait [#allocation3], 256  }
  0x34   :  { %1158 = vsyncadd [#allocation3], 4294967040 }
  0x35   :  { %1159 = dma.done.wait [#allocation6], 256  }
  0x36   :  { %1160 = vsyncadd [#allocation6], 4294967040  ;;  %v1168_v0 = vmov 0.0   ;;  %v1169_v1 = vmov 0   ;;  %vm66_vm0 = vcmask 1043456   ;;  %vm62_vm1 = vcmask 31744  }
  0x37   :  { %137 = vmatprep.mubr.f32.mxu0 %v1168_v0  ;;  %612 = vmatprep.mubr.f32.mxu1 %v1168_v0  ;;  %v54_v2 = vld [vmem:[#allocation2] sm:$0xff]  ;;  %v539_v3 = vld [vmem:[#allocation2 + $0x8] sm:$0xff]  ;;  %v52_v4 = vld [vmem:[#allocation5] sm:$0xff]  ;;  %s1170_s2 = smov [#allocation8]  }
  0x38   :  { %1066 = vset.pattern.permute.xlu0 %v1169_v1  ;;  %v61_v5 = vcombine.high %v54_v2, %v54_v2  ;;  %v541_v6 = vcombine.high %v539_v3, %v539_v3  ;;  %v67_v7 = vsel %vm66_vm0, %v54_v2, 0  ;;  %v542_v8 = vsel %vm66_vm0, %v539_v3, 0  ;;  %v53_v9 = vld [vmem:[#allocation7] sm:$0xff]  ;;  %s1019_s21 = sshll.u32 %s1170_s2, 4  ;;  %s1020_s21 = int_to_ptr.vmem [resolvable:$true] %s1019_s21 }
  0x39   :  { %v1238_v10 = vand.u32 4294901760, %v67_v7  ;;  %v1240_v11 = vand.u32 4294901760, %v542_v8  ;;  %v64_v12 = vsel %vm62_vm1, %v52_v4, 0  ;;  %57 = vperm.xlu0 %1066, %v53_v9   ;;  %s1135_s22 = scalar_lea.vmem %s1020_s21, 512  ;;  %p1140_p11 = scmp.lt.s32.totalorder %s1020_s21, %s1020_s21 }
  0x3a   :  { %v69_v13 = vsel %vm66_vm0, %v61_v5, 0  ;;  %v544_v14 = vsel %vm66_vm0, %v541_v6, 0  ;;  %v1242_v15 = vand.u32 4294901760, %v64_v12  ;;  %p1136_p10 = scmp.ne.s32.totalorder %s1020_s21, %s1135_s22  ;;  %p1141_p12 = scmp.lt.s32.totalorder %s1135_s22, %s1135_s22 }
  0x3b   :  { %v71_v16 = vand.u32 4294901760, %v69_v13  ;;  %v546_v17 = vand.u32 4294901760, %v544_v14  ;;  %v156_v18 = vsub.f32 %v67_v7, %v1238_v10  ;;  %v631_v19 = vsub.f32 %v542_v8, %v1240_v11 }
  0x3c   :  { %v139_v20 = vsub.f32 %v64_v12, %v1242_v15  ;;  %p1142_p13 = por %p1141_p12, %p1140_p11 }
  0x3d   :  { %72 = vmatprep.subr.mxu0 %v71_v16  ;;  %547 = vmatprep.subr.mxu1 %v546_v17  ;;  %v150_v21 = vsub.f32 %v69_v13, %v71_v16  ;;  %v625_v22 = vsub.f32 %v544_v14, %v546_v17  ;;  %v157_v23 = vand.u32 4294901760, %v156_v18  ;;  %v632_v24 = vand.u32 4294901760, %v631_v19 }
  0x3e   :  { %74 = vmatpush1.msra.mxu0 %v1238_v10  ;;  %549 = vmatpush1.msra.mxu1 %v1240_v11  ;;  %v140_v25 = vand.u32 4294901760, %v139_v20  ;;  %p1143_p0 = pnand %p1142_p13, %p1136_p10 }
  0x3f   :  { %v151_v26 = vand.u32 4294901760, %v150_v21  ;;  %v626_v27 = vand.u32 4294901760, %v625_v22  ;;  %v158_v28 = vsub.f32 %v156_v18, %v157_v23  ;;  %v633_v29 = vsub.f32 %v631_v19, %v632_v24 }
  0x40   :  { %v141_v30 = vsub.f32 %v139_v20, %v140_v25 }
  0x41   :  { %v152_v31 = vsub.f32 %v150_v21, %v151_v26  ;;  %v627_v32 = vsub.f32 %v625_v22, %v626_v27  ;;  %v159_v34 = vand.u32 4294901760, %v158_v28  ;;  %v634_v35 = vand.u32 4294901760, %v633_v29 }
  0x42   :  { %v142_v33 = vand.u32 4294901760, %v141_v30 }
  0x43   :  { %v153_v36 = vand.u32 4294901760, %v152_v31  ;;  %v628_v37 = vand.u32 4294901760, %v627_v32 }
  0x44   :  { %143 = vmatmul.mubr.f32.vlgmr.msra.gmra.mrb[0].mxu0 %v142_v33  ;;  %618 = vmatmul.mubr.f32.vlgmr.msra.gmra.mrb[0].mxu1 %v142_v33 }
  0x45   :  { %154 = vmatprep.subr.mxu0 %v153_v36  ;;  %629 = vmatprep.subr.mxu1 %v628_v37 }
  0x46   :  { %160 = vmatpush1.msra.mxu0 %v159_v34  ;;  %635 = vmatpush1.msra.mxu1 %v634_v35 }
  0x47   :  { %223 = vmatprep.mubr.f32.mxu0 %v1168_v0  ;;  %698 = vmatprep.mubr.f32.mxu1 %v1168_v0 }
  0x48   :  { %233 = vmatprep.subr.mxu0 %v150_v21  ;;  %708 = vmatprep.subr.mxu1 %v625_v22 }
  0x4c   :  { %225 = vmatmul.mubr.f32.vlgmr.msra.gmra.mrb[0].mxu0 %v1242_v15  ;;  %700 = vmatmul.mubr.f32.vlgmr.msra.gmra.mrb[0].mxu1 %v1242_v15 }
  0x4d   :  { %236 = vmatpush1.msra.mxu0 %v156_v18  ;;  %711 = vmatpush1.msra.mxu1 %v631_v19 }
  0x4e   :  { %299 = vmatprep.mubr.f32.mxu0 %v1168_v0  ;;  %774 = vmatprep.mubr.f32.mxu1 %v1168_v0 }
  0x4f   :  { %309 = vmatprep.subr.mxu0 %v71_v16  ;;  %784 = vmatprep.subr.mxu1 %v546_v17 }
  0x54   :  { %302 = vmatmul.mubr.f32.vlgmr.msra.gmra.mrb[0].mxu0 %v139_v20  ;;  %777 = vmatmul.mubr.f32.vlgmr.msra.gmra.mrb[0].mxu1 %v139_v20 }
  0x55   :  { %311 = vmatpush1.msra.mxu0 %v1238_v10  ;;  %786 = vmatpush1.msra.mxu1 %v1240_v11 }
  0x56   :  { %374 = vmatprep.mubr.f32.mxu0 %v1168_v0  ;;  %849 = vmatprep.mubr.f32.mxu1 %v1168_v0 }
  0x57   :  { %387 = vmatprep.subr.mxu0 %v151_v26  ;;  %862 = vmatprep.subr.mxu1 %v626_v27 }
  0x5c   :  { %378 = vmatmul.mubr.f32.vlgmr.msra.gmra.mrb[0].mxu0 %v140_v25  ;;  %853 = vmatmul.mubr.f32.vlgmr.msra.gmra.mrb[0].mxu1 %v140_v25 }
  0x5d   :  { %391 = vmatpush1.msra.mxu0 %v157_v23  ;;  %866 = vmatpush1.msra.mxu1 %v632_v24 }
  0x5e   :  { %454 = vmatprep.mubr.f32.mxu0 %v1168_v0  ;;  %929 = vmatprep.mubr.f32.mxu1 %v1168_v0 }
  0x5f   :  { %463 = vmatprep.subr.mxu0 %v71_v16  ;;  %938 = vmatprep.subr.mxu1 %v546_v17 }
  0x64   :  { %456 = vmatmul.mubr.f32.vlgmr.msra.gmra.mrb[0].mxu0 %v1242_v15  ;;  %931 = vmatmul.mubr.f32.vlgmr.msra.gmra.mrb[0].mxu1 %v1242_v15 }
  0x65   :  { %465 = vmatpush1.msra.mxu0 %v1238_v10  ;;  %940 = vmatpush1.msra.mxu1 %v1240_v11 }
  0x66   :  { %528 = vmatprep.mubr.f32.mxu0 %v1168_v0  ;;  %1003 = vmatprep.mubr.f32.mxu1 %v1168_v0 }
  0x6c   :  { %530 = vmatmul.mubr.f32.vlgmr.msra.gmra.mrb[0].mxu0 %v1242_v15  ;;  %1005 = vmatmul.mubr.f32.vlgmr.msra.gmra.mrb[0].mxu1 %v1242_v15 }
  0xb8   :  { %v58_v38 = vpop.permute.xlu0 %57 }
 0x13f   :  { %v531_v39 = vpop.f32.mrb[0].mxu0  ;;  %v1006_v40 = vpop.f32.mrb[0].mxu1 }
 0x140   :  { %v1032_v41 = vadd.f32 %v531_v39, %v58_v38  ;;  %v1034_v42 = vadd.f32 %v1006_v40, %v58_v38  ;;  %v533_v43 = vpop.f32.mrb[1].mxu0  ;;  %v1008_v44 = vpop.f32.mrb[1].mxu1 }
 0x141   :  { %v1033_v45 = vadd.f32 %v533_v43, %v58_v38  ;;  %v1035_v46 = vadd.f32 %v1008_v44, %v58_v38 }
 0x142   :  { %536 = vst [vmem:[#allocation8] sm:$0xff] %v1032_v41  ;;  %1012 = vst [vmem:[#allocation8 + $0x10] sm:$0xff] %v1034_v42 }
 0x143   :  { %537 = vst [vmem:[#allocation8 + $0x8] sm:$0xff] %v1033_v45  ;;  %1013 = vst [vmem:[#allocation8 + $0x18] sm:$0xff] %v1035_v46 }
 0x144   :  { %1146 = shalt.err (!%p1143_p0)
}
 0x145   :  { %s1147_s25 = scalar_lea.hbm %s1284_s3, 512 }
 0x146   :  { %p1148_p1 = scmp.ne.s32.totalorder %s1284_s3, %s1147_s25  ;;  %p1151_p2 = scmp.lt.u32.totalorder %s1147_s25, %s1284_s3 }
 0x148   :  { %p1153_p3 = pnand %p1151_p2, %p1148_p1 }
 0x14a   :  { %1156 = shalt.err (!%p1153_p3)
}
 0x14b   :  { %s1171_s30 = smov 256   ;;  %s1172_s4 = smov 16  }
 0x14c   :  { %1025 = dma.vmem_to_hbm [thread:$0]  %s1020_s21, 512, %s1284_s3, [#allocation4], %s1171_s30, %s1171_s30, %s1172_s4  }
 0x14d   :  { %1161 = dma.done.wait [#allocation4], 512  }
 0x14e   :  { %1162 = vsyncadd [#allocation4], 4294966784 }
 0x14f   :  { %1029 = vsyncpa [#allocation3], 1 }
 0x150   :  { %1030 = vsyncpa [#allocation6], 1 }
 0x151   :  { %1031 = vsyncpa [#allocation4], 1 }

</bundles_post_ra>
